<compile_context>
chip_gen: v7x
topology: tpu7x:2x2x1
jax: 0.10.0
libtpu: 0.0.40
codegen_flags: <defaults>
</compile_context>

<pallas_src>
import functools
import math

import jax
import jax.numpy as jnp
from jax.experimental import pallas as pl
from jax.experimental.pallas import tpu as pltpu

_LANE = 128                       # lane width / MXU-native edge
_MIB = 1024 * 1024
# Conservative: v7x has 64 MiB physical VMEM per TensorCore (v5e/v6e: 128 MiB).
_DEFAULT_VMEM_BUDGET = 40 * _MIB  # gate for the fully-resident fused path
_VMEM_LIMIT_CAP = 60 * _MIB       # never ask for more than this


def _round_up(v, m):
    return (v + m - 1) // m * m


# --------------------------------------------------------------------------
# Kernels
# --------------------------------------------------------------------------
def _gcn_fused_kernel(x_ref, adj_ref, w1_ref, b1_ref, w2_ref, b2_ref, out_ref):
    """Small-graph path: both layers fused, adj VMEM-resident, one launch."""
    adj = adj_ref[...]                                                    # (N, N) bf16
    s1 = jnp.dot(x_ref[...], w1_ref[...],
                 preferred_element_type=jnp.float32)                      # (N, H) f32
    h = jnp.dot(adj, s1.astype(jnp.bfloat16),
                preferred_element_type=jnp.float32)                       # (N, H) f32
    h = jnp.maximum(h + b1_ref[...], 0.0).astype(jnp.bfloat16)
    # TODO(synk): F.dropout(h, p, training=False) is identity in eval mode.
    s2 = jnp.dot(h, w2_ref[...], preferred_element_type=jnp.float32)      # (N, C) f32
    y = jnp.dot(adj, s2.astype(jnp.bfloat16),
                preferred_element_type=jnp.float32)                       # (N, C) f32
    out_ref[...] = jnp.tanh(y + b2_ref[...]).astype(out_ref.dtype)


def _dense_kernel(feat_ref, w_ref, out_ref):
    """Row tile of support = feat @ W (f32 accumulate, bf16 out)."""
    out_ref[...] = jnp.dot(feat_ref[...], w_ref[...],
                           preferred_element_type=jnp.float32
                           ).astype(out_ref.dtype)


def _propagate_kernel(adj_ref, sup_ref, b_ref, out_ref, *, activation):
    """Row tile of act(adj_tile @ support + b); adj tiles are streamed."""
    y = jnp.dot(adj_ref[...], sup_ref[...],
                preferred_element_type=jnp.float32)
    y = y + b_ref[...]
    if activation == "relu":
        y = jnp.maximum(y, 0.0)
    else:
        y = jnp.tanh(y)
    out_ref[...] = y.astype(out_ref.dtype)


# --------------------------------------------------------------------------
# pallas_call wrappers
# --------------------------------------------------------------------------
def _fused_forward(x_p, adj_p, w1, b1, w2, b2):
    n_p = adj_p.shape[0]
    f_p, h_p = w1.shape
    c_p = w2.shape[1]
    vmem = pltpu.MemorySpace.VMEM

    io_bytes = int(x_p.size * 2 + adj_p.size * 2 + w1.size * 2 + w2.size * 2
                   + (b1.size + b2.size) * 4 + n_p * c_p * 2)
    # rough f32/bf16 intermediate footprint on top of the IO buffers
    need = io_bytes + n_p * h_p * 10 + n_p * c_p * 10
    vmem_limit = int(min(max(2 * need, 32 * _MIB), _VMEM_LIMIT_CAP))
    flops = 2 * n_p * (f_p * h_p + n_p * h_p + h_p * c_p + n_p * c_p)

    return pl.pallas_call(
        _gcn_fused_kernel,
        out_shape=jax.ShapeDtypeStruct((n_p, c_p), jnp.bfloat16),
        in_specs=[
            pl.BlockSpec((n_p, f_p), lambda: (0, 0), memory_space=vmem),
            pl.BlockSpec((n_p, n_p), lambda: (0, 0), memory_space=vmem),
            pl.BlockSpec((f_p, h_p), lambda: (0, 0), memory_space=vmem),
            pl.BlockSpec((1, h_p), lambda: (0, 0), memory_space=vmem),
            pl.BlockSpec((h_p, c_p), lambda: (0, 0), memory_space=vmem),
            pl.BlockSpec((1, c_p), lambda: (0, 0), memory_space=vmem),
        ],
        out_specs=pl.BlockSpec((n_p, c_p), lambda: (0, 0), memory_space=vmem),
        compiler_params=pltpu.CompilerParams(vmem_limit_bytes=vmem_limit),
        cost_estimate=pl.CostEstimate(
            flops=int(flops),
            transcendentals=int(n_p * c_p),
            bytes_accessed=io_bytes),
    )(x_p, adj_p, w1, b1, w2, b2)


def _dense(feat, w, tm):
    """support = feat @ W, row-tiled & pipelined."""
    n_p, f_p = feat.shape
    h_p = w.shape[1]
    need = 2 * (tm * f_p * 2) + f_p * h_p * 2 + 2 * (tm * h_p * 2) + 2 * _MIB
    vmem_limit = int(min(max(need, 32 * _MIB), _VMEM_LIMIT_CAP))
    return pl.pallas_call(
        _dense_kernel,
        out_shape=jax.ShapeDtypeStruct((n_p, h_p), jnp.bfloat16),
        grid=(n_p // tm,),
        in_specs=[pl.BlockSpec((tm, f_p), lambda i: (i, 0)),
                  pl.BlockSpec((f_p, h_p), lambda i: (0, 0))],
        out_specs=pl.BlockSpec((tm, h_p), lambda i: (i, 0)),
        compiler_params=pltpu.CompilerParams(
            dimension_semantics=("parallel",),
            vmem_limit_bytes=vmem_limit),
        cost_estimate=pl.CostEstimate(
            flops=int(2 * n_p * f_p * h_p),
            transcendentals=0,
            bytes_accessed=int((n_p * f_p + f_p * h_p + n_p * h_p) * 2)),
    )(feat, w)


def _propagate(adj, support, bias, tm, activation):
    """act(adj @ support + b); adj streamed in (tm, N) row tiles."""
    n_p = adj.shape[0]
    h_p = support.shape[1]
    need = (2 * (tm * n_p * 2) + n_p * h_p * 2 + h_p * 4
            + 2 * (tm * h_p * 2) + 2 * _MIB)
    vmem_limit = int(min(max(need, 32 * _MIB), _VMEM_LIMIT_CAP))
    kernel = functools.partial(_propagate_kernel, activation=activation)
    return pl.pallas_call(
        kernel,
        out_shape=jax.ShapeDtypeStruct((n_p, h_p), jnp.bfloat16),
        grid=(n_p // tm,),
        in_specs=[pl.BlockSpec((tm, n_p), lambda i: (i, 0)),   # streamed adj rows
                  pl.BlockSpec((n_p, h_p), lambda i: (0, 0)),  # support, resident
                  pl.BlockSpec((1, h_p), lambda i: (0, 0))],   # bias, resident
        out_specs=pl.BlockSpec((tm, h_p), lambda i: (i, 0)),
        compiler_params=pltpu.CompilerParams(
            dimension_semantics=("parallel",),
            vmem_limit_bytes=vmem_limit),
        cost_estimate=pl.CostEstimate(
            flops=int(2 * n_p * n_p * h_p),
            transcendentals=int(n_p * h_p) if activation == "tanh" else 0,
            bytes_accessed=int((n_p * n_p + 2 * n_p * h_p) * 2)),
    )(adj, support, bias)


# --------------------------------------------------------------------------
# Public API
# --------------------------------------------------------------------------
def prepare_gcn_params(params):
    """Pad & cast GCN weights once (hoisted out of the per-call wrapper)."""
    w1, b1, w2, b2 = params
    f_in, nhid = w1.shape
    nclass = w2.shape[1]
    f_p = _round_up(f_in, _LANE)
    h_p = _round_up(nhid, _LANE)
    c_p = _round_up(nclass, _LANE)
    w1_p = jnp.zeros((f_p, h_p), jnp.bfloat16).at[:f_in, :nhid].set(
        w1.astype(jnp.bfloat16))
    b1_p = jnp.zeros((1, h_p), jnp.float32).at[0, :nhid].set(
        b1.astype(jnp.float32))
    w2_p = jnp.zeros((h_p, c_p), jnp.bfloat16).at[:nhid, :nclass].set(
        w2.astype(jnp.bfloat16))
    b2_p = jnp.zeros((1, c_p), jnp.float32).at[0, :nclass].set(
        b2.astype(jnp.float32))
    return {"w1": w1_p, "b1": b1_p, "w2": w2_p, "b2": b2_p,
            "nfeat": f_in, "nhid": nhid, "nclass": nclass}


def gcn_forward(x, adj, prepared, dropout_p=0.5, training=False,
                vmem_budget_bytes=_DEFAULT_VMEM_BUDGET):
    """GCN forward: tanh(adj @ (relu(adj @ (x @ W1) + b1) @ W2) + b2)."""
    del dropout_p, training  # eval-mode dropout == identity
    n, f_in = x.shape
    assert f_in == prepared["nfeat"]
    nclass = prepared["nclass"]
    w1, b1 = prepared["w1"], prepared["b1"]
    w2, b2 = prepared["w2"], prepared["b2"]
    f_p, h_p = w1.shape
    c_p = w2.shape[1]

    n_p = _round_up(n, _LANE)

    # Pad/cast activations; skip the padded HBM copy when already aligned.
    # Padded adj rows/cols are zero so padded rows of h (= relu(b1)) never
    # pollute valid output rows; padded feature columns stay exactly zero.
    if x.shape == (n_p, f_p) and x.dtype == jnp.bfloat16:
        x_p = x
    else:
        x_p = jnp.zeros((n_p, f_p), jnp.bfloat16).at[:n, :f_in].set(
            x.astype(jnp.bfloat16))
    if adj.shape == (n_p, n_p) and adj.dtype == jnp.bfloat16:
        adj_p = adj
    elif adj.shape == (n_p, n_p):
        adj_p = adj.astype(jnp.bfloat16)
    else:
        adj_p = jnp.zeros((n_p, n_p), jnp.bfloat16).at[:n, :n].set(
            adj.astype(jnp.bfloat16))

    # VMEM footprint estimate of the fully-resident fused path; beyond the
    # budget, stream adj row tiles instead (v7x: only 64 MiB physical VMEM).
    resident_need = (adj_p.size * 2 + x_p.size * 2 + w1.size * 2 + w2.size * 2
                     + (b1.size + b2.size) * 4
                     + n_p * h_p * 10 + n_p * c_p * 10)
    if resident_need <= vmem_budget_bytes:
        out_p = _fused_forward(x_p, adj_p, w1, b1, w2, b2)
    else:
        tm = 256 if n_p % 256 == 0 else _LANE
        s1 = _dense(x_p, w1, tm)                       # x @ W1
        h = _propagate(adj_p, s1, b1, tm, "relu")      # relu(adj @ s1 + b1)
        s2 = _dense(h, w2, tm)                         # h @ W2
        out_p = _propagate(adj_p, s2, b2, tm, "tanh")  # tanh(adj @ s2 + b2)

    return out_p[:n, :nclass].astype(jnp.float32)


def init_gcn_params(key, nfeat, nhid, nclass):
    """Mirrors GraphConvolution.reset_parameters(): U(-1/sqrt(out), 1/sqrt(out))."""
    k1, k2, k3, k4 = jax.random.split(key, 4)
    s1 = 1.0 / math.sqrt(nhid)
    s2 = 1.0 / math.sqrt(nclass)
    w1 = jax.random.uniform(k1, (nfeat, nhid), jnp.float32, -s1, s1)
    b1 = jax.random.uniform(k2, (nhid,), jnp.float32, -s1, s1)
    w2 = jax.random.uniform(k3, (nhid, nclass), jnp.float32, -s2, s2)
    b2 = jax.random.uniform(k4, (nclass,), jnp.float32, -s2, s2)
    return (w1, b1, w2, b2)


def _reference(x, adj, params):
    """Pure-JAX f32 reference."""
    w1, b1, w2, b2 = params
    h = jnp.maximum(adj @ (x @ w1) + b1, 0.0)
    return jnp.tanh(adj @ (h @ w2) + b2)


if __name__ == "__main__":
    key = jax.random.PRNGKey(0)
    k_x, k_adj, k_p = jax.random.split(key, 3)

    N, NFEAT, NHID, NCLASS = 32, 16, 32, 8

    # Node features.
    x = jax.random.normal(k_x, (N, NFEAT), jnp.float32)

    # Symmetric-normalized adjacency with self-loops (typical GCN input).
    a = (jax.random.uniform(k_adj, (N, N)) < 0.2).astype(jnp.float32)
    a = jnp.maximum(a, a.T) + jnp.eye(N, dtype=jnp.float32)
    deg = jnp.sum(a, axis=1)
    d_inv_sqrt = 1.0 / jnp.sqrt(deg)
    adj = a * d_inv_sqrt[:, None] * d_inv_sqrt[None, :]

    params = init_gcn_params(k_p, NFEAT, NHID, NCLASS)
    prepared = prepare_gcn_params(params)
    ref = _reference(x, adj, params)

    # Small graph -> fully-resident fused single-launch path.
    out_fused = jax.block_until_ready(
        gcn_forward(x, adj, prepared, dropout_p=0.5, training=False))
    assert out_fused.shape == (N, NCLASS)
    # bf16 matmul operands + bf16 writeback (f32 accumulate) -> loose tol.
    assert jnp.allclose(out_fused, ref, atol=4e-2, rtol=4e-2), \
        "fused path mismatch vs reference"

    # Force the streamed / row-tiled path (used automatically for large N).
    out_tiled = jax.block_until_ready(
        gcn_forward(x, adj, prepared, vmem_budget_bytes=0))
    assert out_tiled.shape == (N, NCLASS)
    assert jnp.allclose(out_tiled, ref, atol=4e-2, rtol=4e-2), \
        "tiled path mismatch vs reference"

    print("KERNEL_OK")
</pallas_src>

<mosaic_0001>
module attributes {stable_mosaic.version = 11 : i64} {
  func.func @_gcn_fused_kernel(%arg0: memref<128x128xbf16, #tpu.memory_space<vmem>>, %arg1: memref<128x128xbf16, #tpu.memory_space<vmem>>, %arg2: memref<128x128xbf16, #tpu.memory_space<vmem>>, %arg3: memref<1x128xf32, #tpu.memory_space<vmem>>, %arg4: memref<128x128xbf16, #tpu.memory_space<vmem>>, %arg5: memref<1x128xf32, #tpu.memory_space<vmem>>, %arg6: memref<128x128xbf16, #tpu.memory_space<vmem>>) attributes {dimension_semantics = [], scalar_prefetch = 0 : i64, scratch_operands = 0 : i64, tpu.core_type = #tpu.core_type<tc>} {
    %c0 = arith.constant 0 : index
    %c0_0 = arith.constant 0 : index
    %0 = vector.load %arg1[%c0, %c0_0] : memref<128x128xbf16, #tpu.memory_space<vmem>>, vector<128x128xbf16>
    %c0_1 = arith.constant 0 : index
    %c0_2 = arith.constant 0 : index
    %1 = vector.load %arg0[%c0_1, %c0_2] : memref<128x128xbf16, #tpu.memory_space<vmem>>, vector<128x128xbf16>
    %c0_3 = arith.constant 0 : index
    %c0_4 = arith.constant 0 : index
    %2 = vector.load %arg2[%c0_3, %c0_4] : memref<128x128xbf16, #tpu.memory_space<vmem>>, vector<128x128xbf16>
    %cst = arith.constant dense<0.000000e+00> : vector<128x128xf32>
    %3 = tpu.matmul %1, %2, %cst {dimension_numbers = #tpu.dot_dimension_numbers<[1], [0], [0], [1], [0, 0, 1, 1], [], []>} : vector<128x128xbf16>, vector<128x128xbf16>, vector<128x128xf32> -> vector<128x128xf32>
    %4 = arith.truncf %3 : vector<128x128xf32> to vector<128x128xbf16>
    %cst_5 = arith.constant dense<0.000000e+00> : vector<128x128xf32>
    %5 = tpu.matmul %0, %4, %cst_5 {dimension_numbers = #tpu.dot_dimension_numbers<[1], [0], [0], [1], [0, 0, 1, 1], [], []>} : vector<128x128xbf16>, vector<128x128xbf16>, vector<128x128xf32> -> vector<128x128xf32>
    %c0_6 = arith.constant 0 : index
    %c0_7 = arith.constant 0 : index
    %6 = vector.load %arg3[%c0_6, %c0_7] : memref<1x128xf32, #tpu.memory_space<vmem>>, vector<1x128xf32>
    %7 = vector.broadcast %6 : vector<1x128xf32> to vector<128x128xf32>
    %8 = arith.addf %5, %7 : vector<128x128xf32>
    %cst_8 = arith.constant 0.000000e+00 : f32
    %9 = vector.broadcast %cst_8 : f32 to vector<128x128xf32>
    %10 = arith.maximumf %8, %9 : vector<128x128xf32>
    %11 = arith.truncf %10 : vector<128x128xf32> to vector<128x128xbf16>
    %c0_9 = arith.constant 0 : index
    %c0_10 = arith.constant 0 : index
    %12 = vector.load %arg4[%c0_9, %c0_10] : memref<128x128xbf16, #tpu.memory_space<vmem>>, vector<128x128xbf16>
    %cst_11 = arith.constant dense<0.000000e+00> : vector<128x128xf32>
    %13 = tpu.matmul %11, %12, %cst_11 {dimension_numbers = #tpu.dot_dimension_numbers<[1], [0], [0], [1], [0, 0, 1, 1], [], []>} : vector<128x128xbf16>, vector<128x128xbf16>, vector<128x128xf32> -> vector<128x128xf32>
    %14 = arith.truncf %13 : vector<128x128xf32> to vector<128x128xbf16>
    %cst_12 = arith.constant dense<0.000000e+00> : vector<128x128xf32>
    %15 = tpu.matmul %0, %14, %cst_12 {dimension_numbers = #tpu.dot_dimension_numbers<[1], [0], [0], [1], [0, 0, 1, 1], [], []>} : vector<128x128xbf16>, vector<128x128xbf16>, vector<128x128xf32> -> vector<128x128xf32>
    %c0_13 = arith.constant 0 : index
    %c0_14 = arith.constant 0 : index
    %16 = vector.load %arg5[%c0_13, %c0_14] : memref<1x128xf32, #tpu.memory_space<vmem>>, vector<1x128xf32>
    %17 = vector.broadcast %16 : vector<1x128xf32> to vector<128x128xf32>
    %18 = arith.addf %15, %17 : vector<128x128xf32>
    %19 = math.tanh %18 : vector<128x128xf32>
    %20 = arith.truncf %19 : vector<128x128xf32> to vector<128x128xbf16>
    %c0_15 = arith.constant 0 : index
    %c0_16 = arith.constant 0 : index
    %21 = vector.load %arg6[%c0_15, %c0_16] : memref<128x128xbf16, #tpu.memory_space<vmem>>, vector<128x128xbf16>
    tpu.vector_store %arg6[%c0_15, %c0_16], %20 {strides = array<i32>} : memref<128x128xbf16, #tpu.memory_space<vmem>>, vector<128x128xbf16>,
    return
  }
}

</mosaic_0001>

<bundles_post_ra>
// kernel: tpu_custom_call.1
= control target key start
LH: loop header
LB: loop body
LE: loop exit
PB: predicated region body
PF: predicated region fallthrough
CT: control target
= control target key end

     0   :  { %11 = vsyncpa [#allocation3], 0  ;;  %s1556_s0 = inlined_call_operand.hbm [shape: bf16[128,128], index: 0, kind: input, shape index: {}]   ;;  %s1557_s1 = inlined_call_operand.hbm [shape: bf16[128,128], index: 1, kind: input, shape index: {}]   ;;  %s1558_s2 = inlined_call_operand.hbm [shape: bf16[128,128], index: 2, kind: input, shape index: {}]   ;;  %s1559_s3 = inlined_call_operand.vmem [shape: f32[1,128], index: 3, kind: input, shape index: {}]   ;;  %s1560_s4 = inlined_call_operand.hbm [shape: bf16[128,128], index: 4, kind: input, shape index: {}]   ;;  %s1561_s5 = inlined_call_operand.vmem [shape: f32[1,128], index: 5, kind: input, shape index: {}]   ;;  %s1562_s6 = inlined_call_operand.hbm [shape: bf16[128,128], index: 6, kind: output, shape index: {}]  }
   0x1   :  { %12 = vsyncpa [#allocation6], 0 }
   0x2   :  { %13 = vsyncpa [#allocation9], 0 }
   0x3   :  { %14 = vsyncpa [#allocation4], 0  ;;  %s1387_s21 = smov [#allocation5]   ;;  %s1388_s23 = smov [#allocation2]  }
   0x4   :  { %s32_s22 = sshll.u32 %s1387_s21, 4  ;;  %s20_s24 = sshll.u32 %s1388_s23, 4  ;;  %s33_s22 = int_to_ptr.vmem [resolvable:$true] %s32_s22  ;;  %s1429_s24 = int_to_ptr.vmem [resolvable:$true] %s20_s24 }
   0x5   :  { %s1269_s27 = scalar_lea.hbm %s1557_s1, 1024 }
   0x6   :  { %p1270_p0 = scmp.ne.s32.totalorder %s1557_s1, %s1269_s27  ;;  %p1273_p1 = scmp.lt.u32.totalorder %s1269_s27, %s1557_s1 }
   0x8   :  { %p1275_p2 = pnand %p1273_p1, %p1270_p0 }
   0xa   :  { %1278 = shalt.err (!%p1275_p2)
}
   0xb   :  { %s1279_s8 = scalar_lea.vmem %s33_s22, 1024  ;;  %p1284_p4 = scmp.lt.s32.totalorder %s33_s22, %s33_s22 }
   0xc   :  { %p1280_p3 = scmp.ne.s32.totalorder %s33_s22, %s1279_s8  ;;  %p1285_p5 = scmp.lt.s32.totalorder %s1279_s8, %s1279_s8 }
   0xe   :  { %p1286_p6 = por %p1285_p5, %p1284_p4 }
  0x10   :  { %p1287_p7 = pnand %p1286_p6, %p1280_p3 }
  0x12   :  { %1290 = shalt.err (!%p1287_p7)
}
  0x13   :  { %s1389_s9 = smov 64   ;;  %s1390_s10 = smov 4  }
  0x14   :  { %38 = dma.hbm_to_vmem [thread:$0]  %s1557_s1, 1024, %s33_s22, [#allocation6], %s1389_s9, %s1389_s9, %s1390_s10  }
  0x15   :  { %s1291_s15 = scalar_lea.hbm %s1556_s0, 1024 }
  0x16   :  { %p1292_p8 = scmp.ne.s32.totalorder %s1556_s0, %s1291_s15  ;;  %p1295_p9 = scmp.lt.u32.totalorder %s1291_s15, %s1556_s0 }
  0x18   :  { %p1297_p10 = pnand %p1295_p9, %p1292_p8 }
  0x1a   :  { %1300 = shalt.err (!%p1297_p10)
}
  0x1b   :  { %s1301_s20 = scalar_lea.vmem %s1429_s24, 1024  ;;  %p1306_p12 = scmp.lt.s32.totalorder %s1429_s24, %s1429_s24 }
  0x1c   :  { %p1302_p11 = scmp.ne.s32.totalorder %s1429_s24, %s1301_s20  ;;  %p1307_p13 = scmp.lt.s32.totalorder %s1301_s20, %s1301_s20 }
  0x1e   :  { %p1308_p0 = por %p1307_p13, %p1306_p12 }
  0x20   :  { %p1309_p1 = pnand %p1308_p0, %p1302_p11 }
  0x22   :  { %1312 = shalt.err (!%p1309_p1)
}
  0x23   :  { %26 = dma.hbm_to_vmem [thread:$0]  %s1556_s0, 1024, %s1429_s24, [#allocation3], %s1389_s9, %s1389_s9, %s1390_s10  }
  0x24   :  { %s1391_s22 = smov [#allocation7]   ;;  %s1392_s25 = smov [#allocation8]  }
  0x25   :  { %s44_s23 = sshll.u32 %s1391_s22, 4  ;;  %s58_s26 = sshll.u32 %s1392_s25, 4  ;;  %s45_s23 = int_to_ptr.vmem [resolvable:$true] %s44_s23  ;;  %s1466_s26 = int_to_ptr.vmem [resolvable:$true] %s58_s26 }
  0x26   :  { %s1313_s29 = scalar_lea.hbm %s1558_s2, 1024 }
  0x27   :  { %p1314_p2 = scmp.ne.s32.totalorder %s1558_s2, %s1313_s29  ;;  %p1317_p3 = scmp.lt.u32.totalorder %s1313_s29, %s1558_s2 }
  0x29   :  { %p1319_p4 = pnand %p1317_p3, %p1314_p2 }
  0x2b   :  { %1322 = shalt.err (!%p1319_p4)
}
  0x2c   :  { %s1323_s0 = scalar_lea.vmem %s45_s23, 1024  ;;  %p1328_p6 = scmp.lt.s32.totalorder %s45_s23, %s45_s23 }
  0x2d   :  { %p1324_p5 = scmp.ne.s32.totalorder %s45_s23, %s1323_s0  ;;  %p1329_p7 = scmp.lt.s32.totalorder %s1323_s0, %s1323_s0 }
  0x2f   :  { %p1330_p8 = por %p1329_p7, %p1328_p6 }
  0x31   :  { %p1331_p9 = pnand %p1330_p8, %p1324_p5 }
  0x33   :  { %1334 = shalt.err (!%p1331_p9)
}
  0x34   :  { %50 = dma.hbm_to_vmem [thread:$0]  %s1558_s2, 1024, %s45_s23, [#allocation6], %s1389_s9, %s1389_s9, %s1390_s10  }
  0x35   :  { %s1335_s15 = scalar_lea.hbm %s1560_s4, 1024 }
  0x36   :  { %p1336_p10 = scmp.ne.s32.totalorder %s1560_s4, %s1335_s15  ;;  %p1339_p11 = scmp.lt.u32.totalorder %s1335_s15, %s1560_s4 }
  0x38   :  { %p1341_p12 = pnand %p1339_p11, %p1336_p10 }
  0x3a   :  { %1344 = shalt.err (!%p1341_p12)
}
  0x3b   :  { %s1345_s20 = scalar_lea.vmem %s1466_s26, 1024  ;;  %p1350_p0 = scmp.lt.s32.totalorder %s1466_s26, %s1466_s26 }
  0x3c   :  { %p1346_p13 = scmp.ne.s32.totalorder %s1466_s26, %s1345_s20  ;;  %p1351_p1 = scmp.lt.s32.totalorder %s1345_s20, %s1345_s20 }
  0x3e   :  { %p1352_p2 = por %p1351_p1, %p1350_p0 }
  0x40   :  { %p1353_p3 = pnand %p1352_p2, %p1346_p13 }
  0x42   :  { %1356 = shalt.err (!%p1353_p3)
}
  0x43   :  { %64 = dma.hbm_to_vmem [thread:$0]  %s1560_s4, 1024, %s1466_s26, [#allocation9], %s1389_s9, %s1389_s9, %s1390_s10  }
  0x44   :  { %1379 = dma.done.wait [#allocation3], 1024  }
  0x45   :  { %1380 = vsyncadd [#allocation3], 4294966272 }
  0x46   :  { %1381 = dma.done.wait [#allocation6], 2048  }
  0x47   :  { %1382 = vsyncadd [#allocation6], 4294965248 }
  0x48   :  { %1383 = dma.done.wait [#allocation9], 1024  }
  0x49   :  { %1384 = vsyncadd [#allocation9], 4294966272  ;;  %v1205_v0 = vld [vmem:[#allocation7] sm:$0xff]   ;;  %v1206_v1 = vld [vmem:[#allocation7 + $0x8] sm:$0xff]  }
  0x4a   :  { %1070 = vmatprep.subr.bf16.mxu0 %v1205_v0  ;;  %v1207_v2 = vld [vmem:[#allocation7 + $0x10] sm:$0xff]   ;;  %v1208_v3 = vld [vmem:[#allocation7 + $0x18] sm:$0xff]   ;;  %v1213_v4 = vld [vmem:[#allocation2] sm:$0xff]  }
  0x4b   :  { %1071 = vmatpush3.bf16.msra.mxu0 %v1205_v0  ;;  %1086 = vmatprep.mubr.bf16.mxu0 %v1213_v4  ;;  %v1209_v5 = vld [vmem:[#allocation7 + $0x20] sm:$0xff]   ;;  %v1210_v6 = vld [vmem:[#allocation7 + $0x28] sm:$0xff]   ;;  %v1211_v7 = vld [vmem:[#allocation7 + $0x30] sm:$0xff]  }
  0x4c   :  { %1072 = vmatprep.subr.bf16.mxu0 %v1206_v1  ;;  %v1212_v8 = vld [vmem:[#allocation7 + $0x38] sm:$0xff]   ;;  %v1214_v9 = vld [vmem:[#allocation2 + $0x8] sm:$0xff]   ;;  %v1215_v10 = vld [vmem:[#allocation2 + $0x10] sm:$0xff]  }
  0x4d   :  { %v1216_v11 = vld [vmem:[#allocation2 + $0x18] sm:$0xff]   ;;  %v1217_v12 = vld [vmem:[#allocation2 + $0x20] sm:$0xff]   ;;  %v1218_v13 = vld [vmem:[#allocation2 + $0x28] sm:$0xff]  }
  0x4e   :  { %v1219_v14 = vld [vmem:[#allocation2 + $0x30] sm:$0xff]   ;;  %v1220_v15 = vld [vmem:[#allocation2 + $0x38] sm:$0xff]   ;;  %v1503_v16 = vld [vmem:[#allocation5] sm:$0xff]  }
  0x4f   :  { %1073 = vmatpush3.bf16.msra.mxu0 %v1206_v1  ;;  %1118 = vmatprep.mubr.bf16.mxu1 %v1503_v16  ;;  %v1229_v17 = vld [vmem:[#allocation8] sm:$0xff]   ;;  %v1230_v18 = vld [vmem:[#allocation8 + $0x8] sm:$0xff]   ;;  %v1231_v19 = vld [vmem:[#allocation8 + $0x10] sm:$0xff]  }
  0x50   :  { %1074 = vmatprep.subr.bf16.mxu0 %v1207_v2  ;;  %v1232_v20 = vld [vmem:[#allocation8 + $0x18] sm:$0xff]   ;;  %v1233_v21 = vld [vmem:[#allocation8 + $0x20] sm:$0xff]   ;;  %v1234_v22 = vld [vmem:[#allocation8 + $0x28] sm:$0xff]  }
  0x51   :  { %v1506_v47 = vld [vmem:[#allocation5 + $0x8] sm:$0xff]   ;;  %v1508_v48 = vld [vmem:[#allocation5 + $0x10] sm:$0xff]   ;;  %v1512_v49 = vld [vmem:[#allocation5 + $0x18] sm:$0xff]  }
  0x52   :  { %v1514_v50 = vld [vmem:[#allocation5 + $0x20] sm:$0xff]   ;;  %v1518_v51 = vld [vmem:[#allocation5 + $0x28] sm:$0xff]   ;;  %v1520_v52 = vld [vmem:[#allocation5 + $0x30] sm:$0xff]  }
  0x53   :  { %1075 = vmatpush3.bf16.msra.mxu0 %v1207_v2  ;;  %v1524_v53 = vld [vmem:[#allocation5 + $0x38] sm:$0xff]   ;;  %v1235_v54 = vld [vmem:[#allocation8 + $0x30] sm:$0xff]   ;;  %v909_v56 = vld [vmem:[%s1559_s3] ss:$0 sm:$0xff] }
  0x54   :  { %1076 = vmatprep.subr.bf16.mxu0 %v1208_v3  ;;  %v1236_v55 = vld [vmem:[#allocation8 + $0x38] sm:$0xff]  }
  0x57   :  { %1077 = vmatpush3.bf16.msra.mxu0 %v1208_v3 }
  0x58   :  { %1078 = vmatprep.subr.bf16.mxu0 %v1209_v5 }
  0x5b   :  { %1079 = vmatpush3.bf16.msra.mxu0 %v1209_v5 }
  0x5c   :  { %1080 = vmatprep.subr.bf16.mxu0 %v1210_v6 }
  0x5f   :  { %1081 = vmatpush3.bf16.msra.mxu0 %v1210_v6 }
  0x60   :  { %1082 = vmatprep.subr.bf16.mxu0 %v1211_v7 }
  0x63   :  { %1083 = vmatpush3.bf16.msra.mxu0 %v1211_v7 }
  0x64   :  { %1084 = vmatprep.subr.bf16.mxu0 %v1212_v8 }
  0x67   :  { %1085 = vmatpush3.bf16.msra.mxu0 %v1212_v8 }
  0x68   :  { %1134 = vmatprep.subr.bf16.mxu0 %v1229_v17 }
  0x6a   :  { %1087 = vmatmul.mubr.bf16.vlgmr.msra.gmra.mrb[0].mxu0 %v1214_v9 }
  0x6b   :  { %1090 = vmatprep.mubr.bf16.mxu0 %v1215_v10  ;;  %1135 = vmatpush3.bf16.msra.mxu0 %v1229_v17 }
  0x6c   :  { %1136 = vmatprep.subr.bf16.mxu0 %v1230_v18 }
  0x6f   :  { %1137 = vmatpush3.bf16.msra.mxu0 %v1230_v18 }
  0x70   :  { %1138 = vmatprep.subr.bf16.mxu0 %v1231_v19 }
  0x72   :  { %1091 = vmatmul.mubr.bf16.gmra.mrb[4].mxu0 %v1216_v11 }
  0x73   :  { %1094 = vmatprep.mubr.bf16.mxu0 %v1217_v12  ;;  %1139 = vmatpush3.bf16.msra.mxu0 %v1231_v19 }
  0x74   :  { %1140 = vmatprep.subr.bf16.mxu0 %v1232_v20 }
  0x77   :  { %1141 = vmatpush3.bf16.msra.mxu0 %v1232_v20 }
  0x78   :  { %1142 = vmatprep.subr.bf16.mxu0 %v1233_v21 }
  0x7a   :  { %1095 = vmatmul.mubr.bf16.gmra.mrb[8].mxu0 %v1218_v13 }
  0x7b   :  { %1098 = vmatprep.mubr.bf16.mxu0 %v1219_v14  ;;  %1143 = vmatpush3.bf16.msra.mxu0 %v1233_v21 }
  0x7c   :  { %1144 = vmatprep.subr.bf16.mxu0 %v1234_v22 }
  0x7f   :  { %1145 = vmatpush3.bf16.msra.mxu0 %v1234_v22 }
  0x80   :  { %1146 = vmatprep.subr.bf16.mxu0 %v1235_v54 }
  0x82   :  { %1099 = vmatmul.mubr.bf16.gmra.mrb[12].mxu0 %v1220_v15 }
  0x83   :  { %1147 = vmatpush3.bf16.msra.mxu0 %v1235_v54 }
  0x84   :  { %1148 = vmatprep.subr.bf16.mxu0 %v1236_v55 }
  0x87   :  { %1149 = vmatpush3.bf16.msra.mxu0 %v1236_v55 }
 0x13d   :  { %v1088_v23 = vpop.f32.mrb[0].mxu0 }
 0x13e   :  { %v258_v24 = vpop.f32.mrb[1].mxu0 }
 0x13f   :  { %v1089_v25 = vpop.f32.mrb[2].mxu0 }
 0x140   :  { %v322_v26 = vpack.c.bf16 %v1089_v25, %v1088_v23  ;;  %v261_v27 = vpop.f32.mrb[3].mxu0 }
 0x141   :  { %v321_v28 = vpack.c.bf16 %v261_v27, %v258_v24 }
 0x143   :  { %1102 = vmatprep.subr.bf16.mxu1 %v321_v28 }
 0x144   :  { %1103 = vmatpush3.bf16.msra.mxu1 %v321_v28 }
 0x145   :  { %v1092_v29 = vpop.f32.mrb[4].mxu0  ;;  %1104 = vmatprep.subr.bf16.mxu1 %v322_v26 }
 0x146   :  { %v274_v30 = vpop.f32.mrb[5].mxu0 }
 0x147   :  { %v1093_v31 = vpop.f32.mrb[6].mxu0 }
 0x148   :  { %v324_v32 = vpack.c.bf16 %v1093_v31, %v1092_v29  ;;  %v277_v33 = vpop.f32.mrb[7].mxu0  ;;  %1105 = vmatpush3.bf16.msra.mxu1 %v322_v26 }
 0x149   :  { %v323_v34 = vpack.c.bf16 %v277_v33, %v274_v30 }
 0x14b   :  { %1106 = vmatprep.subr.bf16.mxu1 %v323_v34 }
 0x14c   :  { %1107 = vmatpush3.bf16.msra.mxu1 %v323_v34 }
 0x14d   :  { %v1096_v35 = vpop.f32.mrb[8].mxu0  ;;  %1108 = vmatprep.subr.bf16.mxu1 %v324_v32 }
 0x14e   :  { %v290_v36 = vpop.f32.mrb[9].mxu0 }
 0x14f   :  { %v1097_v37 = vpop.f32.mrb[10].mxu0 }
 0x150   :  { %v326_v38 = vpack.c.bf16 %v1097_v37, %v1096_v35  ;;  %v293_v39 = vpop.f32.mrb[11].mxu0  ;;  %1109 = vmatpush3.bf16.msra.mxu1 %v324_v32 }
 0x151   :  { %v325_v40 = vpack.c.bf16 %v293_v39, %v290_v36 }
 0x153   :  { %1110 = vmatprep.subr.bf16.mxu1 %v325_v40 }
 0x154   :  { %1111 = vmatpush3.bf16.msra.mxu1 %v325_v40 }
 0x155   :  { %v1100_v41 = vpop.f32.mrb[12].mxu0  ;;  %1112 = vmatprep.subr.bf16.mxu1 %v326_v38 }
 0x156   :  { %v306_v42 = vpop.f32.mrb[13].mxu0 }
 0x157   :  { %v1101_v43 = vpop.f32.mrb[14].mxu0 }
 0x158   :  { %v328_v44 = vpack.c.bf16 %v1101_v43, %v1100_v41  ;;  %v309_v45 = vpop.f32.mrb[15].mxu0  ;;  %1113 = vmatpush3.bf16.msra.mxu1 %v326_v38 }
 0x159   :  { %v327_v46 = vpack.c.bf16 %v309_v45, %v306_v42 }
 0x15b   :  { %1114 = vmatprep.subr.bf16.mxu1 %v327_v46 }
 0x15c   :  { %1115 = vmatpush3.bf16.msra.mxu1 %v327_v46 }
 0x15d   :  { %1116 = vmatprep.subr.bf16.mxu1 %v328_v44 }
 0x160   :  { %1117 = vmatpush3.bf16.msra.mxu1 %v328_v44 }
 0x163   :  { %1119 = vmatmul.mubr.bf16.vlgmr.msra.gmra.mrb[0].mxu1 %v1506_v47 }
 0x164   :  { %1122 = vmatprep.mubr.bf16.mxu1 %v1508_v48 }
 0x16b   :  { %1123 = vmatmul.mubr.bf16.gmra.mrb[4].mxu1 %v1512_v49 }
 0x16c   :  { %1126 = vmatprep.mubr.bf16.mxu1 %v1514_v50 }
 0x173   :  { %1127 = vmatmul.mubr.bf16.gmra.mrb[8].mxu1 %v1518_v51 }
 0x174   :  { %1130 = vmatprep.mubr.bf16.mxu1 %v1520_v52 }
 0x17b   :  { %1131 = vmatmul.mubr.bf16.gmra.mrb[12].mxu1 %v1524_v53 }
 0x17c   :  { %1182 = vmatprep.mubr.bf16.mxu1 %v1503_v16 }
 0x236   :  { %v1120_v57 = vpop.f32.mrb[0].mxu1 }
 0x237   :  { %v427_v58 = vadd.f32 %v1120_v57, %v909_v56  ;;  %v418_v59 = vpop.f32.mrb[1].mxu1 }
 0x238   :  { %v419_v60 = vadd.f32 %v909_v56, %v418_v59  ;;  %v1121_v61 = vpop.f32.mrb[2].mxu1 }
 0x239   :  { %v430_v62 = vadd.f32 %v1121_v61, %v909_v56  ;;  %v421_v63 = vpop.f32.mrb[3].mxu1  ;;  %v483_v1 = vmax.f32 %v427_v58, 0.0 }
 0x23a   :  { %v422_v0 = vadd.f32 %v909_v56, %v421_v63  ;;  %v481_v3 = vmax.f32 %v419_v60, 0.0 }
 0x23b   :  { %v484_v2 = vmax.f32 %v430_v62, 0.0 }
 0x23c   :  { %v482_v4 = vmax.f32 %v422_v0, 0.0 }
 0x23d   :  { %v498_v5 = vpack.c.bf16 %v484_v2, %v483_v1 }
 0x23e   :  { %v497_v6 = vpack.c.bf16 %v482_v4, %v481_v3  ;;  %v1124_v7 = vpop.f32.mrb[4].mxu1 }
 0x23f   :  { %v443_v8 = vadd.f32 %v1124_v7, %v909_v56  ;;  %v434_v9 = vpop.f32.mrb[5].mxu1 }
 0x240   :  { %v435_v10 = vadd.f32 %v909_v56, %v434_v9  ;;  %v1125_v11 = vpop.f32.mrb[6].mxu1  ;;  %1150 = vmatprep.mubr.bf16.mxu0 %v497_v6 }
 0x241   :  { %v446_v12 = vadd.f32 %v1125_v11, %v909_v56  ;;  %v437_v13 = vpop.f32.mrb[7].mxu1  ;;  %1151 = vmatmul.mubr.bf16.vlgmr.msra.gmra.mrb[16].mxu0 %v498_v5  ;;  %v487_v15 = vmax.f32 %v443_v8, 0.0 }
 0x242   :  { %v438_v14 = vadd.f32 %v909_v56, %v437_v13  ;;  %v485_v17 = vmax.f32 %v435_v10, 0.0 }
 0x243   :  { %v488_v16 = vmax.f32 %v446_v12, 0.0 }
 0x244   :  { %v486_v18 = vmax.f32 %v438_v14, 0.0 }
 0x245   :  { %v500_v19 = vpack.c.bf16 %v488_v16, %v487_v15  ;;  %v926_v16 = vld [vmem:[%s1561_s5] ss:$0 sm:$0xff]  ;;  %s1393_s5 = smov [#allocation10]  }
 0x246   :  { %v499_v20 = vpack.c.bf16 %v486_v18, %v485_v17  ;;  %v1128_v21 = vpop.f32.mrb[8].mxu1  ;;  %s879_s23 = sshll.u32 %s1393_s5, 4  ;;  %s880_s23 = int_to_ptr.vmem [resolvable:$true] %s879_s23 }
 0x247   :  { %v459_v22 = vadd.f32 %v1128_v21, %v909_v56  ;;  %v450_v23 = vpop.f32.mrb[9].mxu1  ;;  %s1357_s25 = scalar_lea.vmem %s880_s23, 1024  ;;  %p1362_p5 = scmp.lt.s32.totalorder %s880_s23, %s880_s23 }
 0x248   :  { %v451_v24 = vadd.f32 %v909_v56, %v450_v23  ;;  %v1129_v25 = vpop.f32.mrb[10].mxu1  ;;  %1154 = vmatprep.mubr.bf16.mxu0 %v499_v20  ;;  %p1358_p4 = scmp.ne.s32.totalorder %s880_s23, %s1357_s25  ;;  %p1363_p6 = scmp.lt.s32.totalorder %s1357_s25, %s1357_s25 }
 0x249   :  { %v462_v26 = vadd.f32 %v1129_v25, %v909_v56  ;;  %v453_v27 = vpop.f32.mrb[11].mxu1  ;;  %1155 = vmatmul.mubr.bf16.gmra.mrb[20].mxu0 %v500_v19  ;;  %v491_v29 = vmax.f32 %v459_v22, 0.0 }
 0x24a   :  { %v454_v28 = vadd.f32 %v909_v56, %v453_v27  ;;  %v489_v31 = vmax.f32 %v451_v24, 0.0  ;;  %p1364_p7 = por %p1363_p6, %p1362_p5 }
 0x24b   :  { %v492_v30 = vmax.f32 %v462_v26, 0.0 }
 0x24c   :  { %v490_v32 = vmax.f32 %v454_v28, 0.0  ;;  %p1365_p8 = pnand %p1364_p7, %p1358_p4 }
 0x24d   :  { %v502_v33 = vpack.c.bf16 %v492_v30, %v491_v29 }
 0x24e   :  { %v501_v34 = vpack.c.bf16 %v490_v32, %v489_v31  ;;  %v1132_v35 = vpop.f32.mrb[12].mxu1 }
 0x24f   :  { %v475_v36 = vadd.f32 %v1132_v35, %v909_v56  ;;  %v466_v37 = vpop.f32.mrb[13].mxu1 }
 0x250   :  { %v467_v38 = vadd.f32 %v909_v56, %v466_v37  ;;  %v1133_v39 = vpop.f32.mrb[14].mxu1  ;;  %1158 = vmatprep.mubr.bf16.mxu0 %v501_v34 }
 0x251   :  { %v478_v40 = vadd.f32 %v1133_v39, %v909_v56  ;;  %v469_v41 = vpop.f32.mrb[15].mxu1  ;;  %1159 = vmatmul.mubr.bf16.gmra.mrb[24].mxu0 %v502_v33  ;;  %v495_v43 = vmax.f32 %v475_v36, 0.0 }
 0x252   :  { %v470_v42 = vadd.f32 %v909_v56, %v469_v41  ;;  %v493_v45 = vmax.f32 %v467_v38, 0.0 }
 0x253   :  { %v496_v44 = vmax.f32 %v478_v40, 0.0 }
 0x254   :  { %v494_v46 = vmax.f32 %v470_v42, 0.0 }
 0x255   :  { %v504_v54 = vpack.c.bf16 %v496_v44, %v495_v43 }
 0x256   :  { %v503_v55 = vpack.c.bf16 %v494_v46, %v493_v45 }
 0x258   :  { %1162 = vmatprep.mubr.bf16.mxu0 %v503_v55 }
 0x259   :  { %1163 = vmatmul.mubr.bf16.gmra.mrb[28].mxu0 %v504_v54 }
 0x314   :  { %v1152_v57 = vpop.f32.mrb[16].mxu0 }
 0x315   :  { %v603_v58 = vpop.f32.mrb[17].mxu0 }
 0x316   :  { %v1153_v59 = vpop.f32.mrb[18].mxu0 }
 0x317   :  { %v667_v60 = vpack.c.bf16 %v1153_v59, %v1152_v57  ;;  %v606_v61 = vpop.f32.mrb[19].mxu0 }
 0x318   :  { %v666_v62 = vpack.c.bf16 %v606_v61, %v603_v58 }
 0x31a   :  { %1166 = vmatprep.subr.bf16.mxu1 %v666_v62 }
 0x31b   :  { %1167 = vmatpush3.bf16.msra.mxu1 %v666_v62 }
 0x31c   :  { %v1156_v63 = vpop.f32.mrb[20].mxu0  ;;  %1168 = vmatprep.subr.bf16.mxu1 %v667_v60 }
 0x31d   :  { %v619_v0 = vpop.f32.mrb[21].mxu0 }
 0x31e   :  { %v1157_v56 = vpop.f32.mrb[22].mxu0 }
 0x31f   :  { %v669_v1 = vpack.c.bf16 %v1157_v56, %v1156_v63  ;;  %v622_v2 = vpop.f32.mrb[23].mxu0  ;;  %1169 = vmatpush3.bf16.msra.mxu1 %v667_v60 }
 0x320   :  { %v668_v3 = vpack.c.bf16 %v622_v2, %v619_v0 }
 0x322   :  { %1170 = vmatprep.subr.bf16.mxu1 %v668_v3 }
 0x323   :  { %1171 = vmatpush3.bf16.msra.mxu1 %v668_v3 }
 0x324   :  { %v1160_v4 = vpop.f32.mrb[24].mxu0  ;;  %1172 = vmatprep.subr.bf16.mxu1 %v669_v1 }
 0x325   :  { %v635_v5 = vpop.f32.mrb[25].mxu0 }
 0x326   :  { %v1161_v6 = vpop.f32.mrb[26].mxu0 }
 0x327   :  { %v671_v7 = vpack.c.bf16 %v1161_v6, %v1160_v4  ;;  %v638_v8 = vpop.f32.mrb[27].mxu0  ;;  %1173 = vmatpush3.bf16.msra.mxu1 %v669_v1 }
 0x328   :  { %v670_v9 = vpack.c.bf16 %v638_v8, %v635_v5 }
 0x32a   :  { %1174 = vmatprep.subr.bf16.mxu1 %v670_v9 }
 0x32b   :  { %1175 = vmatpush3.bf16.msra.mxu1 %v670_v9 }
 0x32c   :  { %v1164_v10 = vpop.f32.mrb[28].mxu0  ;;  %1176 = vmatprep.subr.bf16.mxu1 %v671_v7 }
 0x32d   :  { %v651_v11 = vpop.f32.mrb[29].mxu0 }
 0x32e   :  { %v1165_v12 = vpop.f32.mrb[30].mxu0 }
 0x32f   :  { %v673_v13 = vpack.c.bf16 %v1165_v12, %v1164_v10  ;;  %v654_v14 = vpop.f32.mrb[31].mxu0  ;;  %1177 = vmatpush3.bf16.msra.mxu1 %v671_v7 }
 0x330   :  { %v672_v15 = vpack.c.bf16 %v654_v14, %v651_v11 }
 0x332   :  { %1178 = vmatprep.subr.bf16.mxu1 %v672_v15 }
 0x333   :  { %1179 = vmatpush3.bf16.msra.mxu1 %v672_v15 }
 0x334   :  { %1180 = vmatprep.subr.bf16.mxu1 %v673_v13 }
 0x337   :  { %1181 = vmatpush3.bf16.msra.mxu1 %v673_v13 }
 0x33a   :  { %1183 = vmatmul.mubr.bf16.vlgmr.msra.gmra.mrb[16].mxu1 %v1506_v47 }
 0x33b   :  { %1186 = vmatprep.mubr.bf16.mxu1 %v1508_v48 }
 0x342   :  { %1187 = vmatmul.mubr.bf16.gmra.mrb[20].mxu1 %v1512_v49 }
 0x343   :  { %1190 = vmatprep.mubr.bf16.mxu1 %v1514_v50 }
 0x34a   :  { %1191 = vmatmul.mubr.bf16.gmra.mrb[24].mxu1 %v1518_v51 }
 0x34b   :  { %1194 = vmatprep.mubr.bf16.mxu1 %v1520_v52 }
 0x352   :  { %1195 = vmatmul.mubr.bf16.gmra.mrb[28].mxu1 %v1524_v53 }
 0x40d   :  { %v1184_v17 = vpop.f32.mrb[16].mxu1 }
 0x40e   :  { %v724_v18 = vadd.f32 %v1184_v17, %v926_v16  ;;  %v715_v19 = vpop.f32.mrb[17].mxu1 }
 0x40f   :  { %v716_v47 = vadd.f32 %v926_v16, %v715_v19  ;;  %v1185_v20 = vpop.f32.mrb[18].mxu1 }
 0x410   :  { %1237 = vtanh.f32 %v724_v18  ;;  %v727_v48 = vadd.f32 %v1185_v20, %v926_v16  ;;  %v718_v49 = vpop.f32.mrb[19].mxu1 }
 0x411   :  { %1239 = vtanh.f32 %v716_v47  ;;  %v719_v50 = vadd.f32 %v926_v16, %v718_v49 }
 0x412   :  { %1241 = vtanh.f32 %v727_v48 }
 0x413   :  { %1243 = vtanh.f32 %v719_v50 }
 0x415   :  { %v1188_v51 = vpop.f32.mrb[20].mxu1 }
 0x416   :  { %v740_v52 = vadd.f32 %v1188_v51, %v926_v16  ;;  %v731_v21 = vpop.f32.mrb[21].mxu1 }
 0x417   :  { %v732_v53 = vadd.f32 %v926_v16, %v731_v21  ;;  %v1189_v22 = vpop.f32.mrb[22].mxu1 }
 0x418   :  { %1245 = vtanh.f32 %v740_v52  ;;  %v743_v23 = vadd.f32 %v1189_v22, %v926_v16  ;;  %v734_v24 = vpop.f32.mrb[23].mxu1 }
 0x419   :  { %1247 = vtanh.f32 %v732_v53  ;;  %v735_v25 = vadd.f32 %v926_v16, %v734_v24 }
 0x41a   :  { %v1238_v26 = vpop.eup %1237  ;;  %1249 = vtanh.f32 %v743_v23 }
 0x41b   :  { %v1240_v27 = vpop.eup %1239  ;;  %1251 = vtanh.f32 %v735_v25 }
 0x41c   :  { %v1242_v28 = vpop.eup %1241 }
 0x41d   :  { %v1244_v29 = vpop.eup %1243  ;;  %v967_v30 = vpack.c.bf16 %v1242_v28, %v1238_v26  ;;  %v1192_v31 = vpop.f32.mrb[24].mxu1 }
 0x41e   :  { %v962_v32 = vpack.c.bf16 %v1244_v29, %v1240_v27  ;;  %v756_v33 = vadd.f32 %v1192_v31, %v926_v16  ;;  %v747_v34 = vpop.f32.mrb[25].mxu1 }
 0x41f   :  { %999 = vst [vmem:[#allocation10 + $0x8] sm:$0xff] %v967_v30   ;;  %v748_v35 = vadd.f32 %v926_v16, %v747_v34  ;;  %v1193_v36 = vpop.f32.mrb[26].mxu1 }
 0x420   :  { %963 = vst [vmem:[#allocation10] sm:$0xff] %v962_v32   ;;  %1253 = vtanh.f32 %v756_v33  ;;  %v759_v37 = vadd.f32 %v1193_v36, %v926_v16  ;;  %v750_v38 = vpop.f32.mrb[27].mxu1 }
 0x421   :  { %1255 = vtanh.f32 %v748_v35  ;;  %v751_v39 = vadd.f32 %v926_v16, %v750_v38 }
 0x422   :  { %v1246_v40 = vpop.eup %1245  ;;  %1257 = vtanh.f32 %v759_v37 }
 0x423   :  { %v1248_v41 = vpop.eup %1247  ;;  %1259 = vtanh.f32 %v751_v39 }
 0x424   :  { %v1250_v42 = vpop.eup %1249 }
 0x425   :  { %v1252_v43 = vpop.eup %1251  ;;  %v977_v44 = vpack.c.bf16 %v1250_v42, %v1246_v40  ;;  %v1196_v45 = vpop.f32.mrb[28].mxu1 }
 0x426   :  { %v972_v46 = vpack.c.bf16 %v1252_v43, %v1248_v41  ;;  %v772_v54 = vadd.f32 %v1196_v45, %v926_v16  ;;  %v763_v55 = vpop.f32.mrb[29].mxu1 }
 0x427   :  { %1001 = vst [vmem:[#allocation10 + $0x18] sm:$0xff] %v977_v44   ;;  %v764_v57 = vadd.f32 %v926_v16, %v763_v55  ;;  %v1197_v58 = vpop.f32.mrb[30].mxu1 }
 0x428   :  { %1000 = vst [vmem:[#allocation10 + $0x10] sm:$0xff] %v972_v46   ;;  %1261 = vtanh.f32 %v772_v54  ;;  %v775_v59 = vadd.f32 %v1197_v58, %v926_v16  ;;  %v766_v60 = vpop.f32.mrb[31].mxu1 }
 0x429   :  { %1263 = vtanh.f32 %v764_v57  ;;  %v767_v61 = vadd.f32 %v926_v16, %v766_v60 }
 0x42a   :  { %v1254_v62 = vpop.eup %1253  ;;  %1265 = vtanh.f32 %v775_v59 }
 0x42b   :  { %v1256_v63 = vpop.eup %1255  ;;  %1267 = vtanh.f32 %v767_v61 }
 0x42c   :  { %v1258_v0 = vpop.eup %1257 }
 0x42d   :  { %v1260_v56 = vpop.eup %1259  ;;  %v987_v1 = vpack.c.bf16 %v1258_v0, %v1254_v62 }
 0x42e   :  { %v982_v2 = vpack.c.bf16 %v1260_v56, %v1256_v63 }
 0x42f   :  { %1003 = vst [vmem:[#allocation10 + $0x28] sm:$0xff] %v987_v1  }
 0x430   :  { %1002 = vst [vmem:[#allocation10 + $0x20] sm:$0xff] %v982_v2  }
 0x432   :  { %v1262_v3 = vpop.eup %1261 }
 0x433   :  { %v1264_v4 = vpop.eup %1263 }
 0x434   :  { %v1266_v5 = vpop.eup %1265 }
 0x435   :  { %v1268_v6 = vpop.eup %1267  ;;  %v997_v7 = vpack.c.bf16 %v1266_v5, %v1262_v3 }
 0x436   :  { %v992_v8 = vpack.c.bf16 %v1268_v6, %v1264_v4 }
 0x437   :  { %1005 = vst [vmem:[#allocation10 + $0x38] sm:$0xff] %v997_v7  }
 0x438   :  { %1004 = vst [vmem:[#allocation10 + $0x30] sm:$0xff] %v992_v8  }
 0x439   :  { %1368 = shalt.err (!%p1365_p8)
}
 0x43a   :  { %s1369_s28 = scalar_lea.hbm %s1562_s6, 1024 }
 0x43b   :  { %p1370_p9 = scmp.ne.s32.totalorder %s1562_s6, %s1369_s28  ;;  %p1373_p10 = scmp.lt.u32.totalorder %s1369_s28, %s1562_s6 }
 0x43d   :  { %p1375_p11 = pnand %p1373_p10, %p1370_p9 }
 0x43f   :  { %1378 = shalt.err (!%p1375_p11)
}
 0x440   :  { %885 = dma.vmem_to_hbm [thread:$0]  %s880_s23, 1024, %s1562_s6, [#allocation4], %s1389_s9, %s1389_s9, %s1390_s10  }
 0x441   :  { %1385 = dma.done.wait [#allocation4], 1024  }
 0x442   :  { %1386 = vsyncadd [#allocation4], 4294966272 }
 0x443   :  { %889 = vsyncpa [#allocation3], 1 }
 0x444   :  { %890 = vsyncpa [#allocation6], 1 }
 0x445   :  { %891 = vsyncpa [#allocation9], 1 }
 0x446   :  { %892 = vsyncpa [#allocation4], 1 }

</bundles_post_ra>
